<compile_context>
chip_gen: v7x
topology: tpu7x:2x2x1
jax: 0.10.0
libtpu: 0.0.40
codegen_flags: <defaults>
</compile_context>

<pallas_src>
import functools

import jax
import jax.numpy as jnp
from jax.experimental import pallas as pl
from jax.experimental.pallas import tpu as pltpu


def cle_kernel(x_ref, w1_ref, b1_ref, w2_ref, b2_ref, w3a_ref, w3b_ref,
               b3_ref, w4_ref, o_ref, *, B, L):
    x = x_ref[...]                                            # (B*L, dim)

    # relu(conv1): (B*L, dim) @ (dim, 32) + b1
    h1 = jnp.maximum(
        jnp.dot(x, w1_ref[...], preferred_element_type=jnp.float32)
        + b1_ref[...], 0.0)                                   # (B*L, 32)

    # relu(conv2): (B*L, 32) @ (32, 64) + b2
    h2 = jnp.maximum(
        jnp.dot(h1, w2_ref[...], preferred_element_type=jnp.float32)
        + b2_ref[...], 0.0)                                   # (B*L, 64)

    # relu(conv3) on cat(h1, h2): concat-free via split weights.
    h3 = jnp.maximum(
        jnp.dot(h1, w3a_ref[...], preferred_element_type=jnp.float32)
        + jnp.dot(h2, w3b_ref[...], preferred_element_type=jnp.float32)
        + b3_ref[...], 0.0)                                   # (B*L, 64)

    # conv4 after x.transpose(1, 2):
    #   out[b, o, d] = sum_l W4[o, l] * h3[b*L + l, d]   (bias added in wrapper)
    w4 = w4_ref[...]                                          # (64, L)
    outs = [
        jnp.dot(w4, h3[b * L:(b + 1) * L, :],
                preferred_element_type=jnp.float32)           # (64, 64)
        for b in range(B)
    ]
    # lane-dense (64, B*64) slab -> single unmasked store
    o_ref[...] = jnp.concatenate(outs, axis=1)


@jax.jit
def characteristic_line_extractor(x, params):
    """x: (B, dim, L) float32 (NCL, like PyTorch).  Returns (B, 64, 64)."""
    w1, b1, w2, b2, w3a, w3b, b3, w4, b4 = params
    B, dim, L = x.shape

    # NCL -> (B*L, dim); under jit the transpose + reshape fuse into one copy.
    x2d = jnp.transpose(x, (0, 2, 1)).reshape(B * L, dim).astype(jnp.float32)

    vmem_spec = pl.BlockSpec(memory_space=pltpu.MemorySpace.VMEM)
    slab = pl.pallas_call(
        functools.partial(cle_kernel, B=B, L=L),
        out_shape=jax.ShapeDtypeStruct((64, B * 64), jnp.float32),
        in_specs=[vmem_spec] * 9,
        out_specs=vmem_spec,
    )(x2d, w1, b1, w2, b2, w3a, w3b, b3, w4)

    # Epilogue (fuses under jit): unpack slab to (B, 64, 64) and add conv4 bias.
    out = slab.reshape(64, B, 64).transpose(1, 0, 2) + b4[None, :, None]
    return out


def init_params(key, dim, input_length):
    """Deterministic init mimicking PyTorch Conv1d default U(-1/sqrt(fan_in), .).

    Weights are stored pre-transposed as (C_in, C_out) for channels-last
    matmuls.  conv3's weight is pre-split (w3a for h1 rows, w3b for h2 rows)
    so the kernel never concatenates channels.  conv4's weight stays (64, L)
    and its bias is a flat (64,) vector added in the wrapper epilogue."""
    ks = jax.random.split(key, 8)

    def u(k, shape, fan_in):
        s = 1.0 / float(fan_in) ** 0.5
        return jax.random.uniform(k, shape, jnp.float32, -s, s)

    w1 = u(ks[0], (dim, 32), dim)
    b1 = u(ks[1], (1, 32), dim)
    w2 = u(ks[2], (32, 64), 32)
    b2 = u(ks[3], (1, 64), 32)
    w3 = u(ks[4], (32 + 64, 64), 32 + 64)          # (Cin, Cout)
    w3a, w3b = w3[:32, :], w3[32:, :]              # split at the concat point
    b3 = u(ks[5], (1, 64), 32 + 64)
    w4 = u(ks[6], (64, input_length), input_length)
    b4 = u(ks[7], (64,), input_length)
    return (w1, b1, w2, b2, w3a, w3b, b3, w4, b4)


def reference(x, params):
    """Pure-JAX reference matching the PyTorch forward (full-precision)."""
    w1, b1, w2, b2, w3a, w3b, b3, w4, b4 = params
    xt = jnp.transpose(x, (0, 2, 1))                              # (B, L, dim)
    h1 = jax.nn.relu(jnp.einsum("bld,dc->blc", xt, w1,
                                precision="highest") + b1)        # (B, L, 32)
    h2 = jax.nn.relu(jnp.einsum("blc,cd->bld", h1, w2,
                                precision="highest") + b2)        # (B, L, 64)
    w3 = jnp.concatenate([w3a, w3b], axis=0)                      # (96, 64)
    hcat = jnp.concatenate([h1, h2], axis=-1)                     # (B, L, 96)
    h3 = jax.nn.relu(jnp.einsum("blc,cd->bld", hcat, w3,
                                precision="highest") + b3)        # (B, L, 64)
    out = jnp.einsum("ol,bld->bod", w4, h3,
                     precision="highest") + b4[None, :, None]     # (B, 64, 64)
    return out


if __name__ == "__main__":
    # Small shapes consistent with the module: batch=2, dim=3, input_length=16.
    B, dim, L = 2, 3, 16
    key = jax.random.PRNGKey(0)
    kx, kp = jax.random.split(key)

    x = jax.random.normal(kx, (B, dim, L), jnp.float32)
    params = init_params(kp, dim, L)

    out = characteristic_line_extractor(x, params)
    out = jax.block_until_ready(out)

    ref = reference(x, params)
    assert out.shape == (B, 64, 64), out.shape
    max_err = float(jnp.max(jnp.abs(out - ref)))
    assert jnp.allclose(out, ref, atol=1e-3, rtol=1e-3), (
        "max abs err: %f" % max_err)

    print("KERNEL_OK")
</pallas_src>

<mosaic_0001>
module attributes {stable_mosaic.version = 11 : i64} {
  func.func @cle_kernel(%arg0: memref<32x3xf32, #tpu.memory_space<vmem>>, %arg1: memref<3x32xf32, #tpu.memory_space<vmem>>, %arg2: memref<1x32xf32, #tpu.memory_space<vmem>>, %arg3: memref<32x64xf32, #tpu.memory_space<vmem>>, %arg4: memref<1x64xf32, #tpu.memory_space<vmem>>, %arg5: memref<32x64xf32, #tpu.memory_space<vmem>>, %arg6: memref<64x64xf32, #tpu.memory_space<vmem>>, %arg7: memref<1x64xf32, #tpu.memory_space<vmem>>, %arg8: memref<64x16xf32, #tpu.memory_space<vmem>>, %arg9: memref<64x128xf32, #tpu.memory_space<vmem>>) attributes {dimension_semantics = [], scalar_prefetch = 0 : i64, scratch_operands = 0 : i64, tpu.core_type = #tpu.core_type<tc>} {
    %c0 = arith.constant 0 : index
    %c0_0 = arith.constant 0 : index
    %0 = vector.load %arg0[%c0, %c0_0] : memref<32x3xf32, #tpu.memory_space<vmem>>, vector<32x3xf32>
    %c0_1 = arith.constant 0 : index
    %c0_2 = arith.constant 0 : index
    %1 = vector.load %arg1[%c0_1, %c0_2] : memref<3x32xf32, #tpu.memory_space<vmem>>, vector<3x32xf32>
    %cst = arith.constant dense<0.000000e+00> : vector<32x32xf32>
    %2 = tpu.matmul %0, %1, %cst {dimension_numbers = #tpu.dot_dimension_numbers<[1], [0], [0], [1], [0, 0, 1, 1], [], []>} : vector<32x3xf32>, vector<3x32xf32>, vector<32x32xf32> -> vector<32x32xf32>
    %c0_3 = arith.constant 0 : index
    %c0_4 = arith.constant 0 : index
    %3 = vector.load %arg2[%c0_3, %c0_4] : memref<1x32xf32, #tpu.memory_space<vmem>>, vector<1x32xf32>
    %4 = vector.broadcast %3 : vector<1x32xf32> to vector<32x32xf32>
    %5 = arith.addf %2, %4 : vector<32x32xf32>
    %cst_5 = arith.constant 0.000000e+00 : f32
    %6 = vector.broadcast %cst_5 : f32 to vector<32x32xf32>
    %7 = arith.maximumf %5, %6 : vector<32x32xf32>
    %c0_6 = arith.constant 0 : index
    %c0_7 = arith.constant 0 : index
    %8 = vector.load %arg3[%c0_6, %c0_7] : memref<32x64xf32, #tpu.memory_space<vmem>>, vector<32x64xf32>
    %cst_8 = arith.constant dense<0.000000e+00> : vector<32x64xf32>
    %9 = tpu.matmul %7, %8, %cst_8 {dimension_numbers = #tpu.dot_dimension_numbers<[1], [0], [0], [1], [0, 0, 1, 1], [], []>} : vector<32x32xf32>, vector<32x64xf32>, vector<32x64xf32> -> vector<32x64xf32>
    %c0_9 = arith.constant 0 : index
    %c0_10 = arith.constant 0 : index
    %10 = vector.load %arg4[%c0_9, %c0_10] : memref<1x64xf32, #tpu.memory_space<vmem>>, vector<1x64xf32>
    %11 = vector.broadcast %10 : vector<1x64xf32> to vector<32x64xf32>
    %12 = arith.addf %9, %11 : vector<32x64xf32>
    %cst_11 = arith.constant 0.000000e+00 : f32
    %13 = vector.broadcast %cst_11 : f32 to vector<32x64xf32>
    %14 = arith.maximumf %12, %13 : vector<32x64xf32>
    %c0_12 = arith.constant 0 : index
    %c0_13 = arith.constant 0 : index
    %15 = vector.load %arg5[%c0_12, %c0_13] : memref<32x64xf32, #tpu.memory_space<vmem>>, vector<32x64xf32>
    %cst_14 = arith.constant dense<0.000000e+00> : vector<32x64xf32>
    %16 = tpu.matmul %7, %15, %cst_14 {dimension_numbers = #tpu.dot_dimension_numbers<[1], [0], [0], [1], [0, 0, 1, 1], [], []>} : vector<32x32xf32>, vector<32x64xf32>, vector<32x64xf32> -> vector<32x64xf32>
    %c0_15 = arith.constant 0 : index
    %c0_16 = arith.constant 0 : index
    %17 = vector.load %arg6[%c0_15, %c0_16] : memref<64x64xf32, #tpu.memory_space<vmem>>, vector<64x64xf32>
    %cst_17 = arith.constant dense<0.000000e+00> : vector<32x64xf32>
    %18 = tpu.matmul %14, %17, %cst_17 {dimension_numbers = #tpu.dot_dimension_numbers<[1], [0], [0], [1], [0, 0, 1, 1], [], []>} : vector<32x64xf32>, vector<64x64xf32>, vector<32x64xf32> -> vector<32x64xf32>
    %19 = arith.addf %16, %18 : vector<32x64xf32>
    %c0_18 = arith.constant 0 : index
    %c0_19 = arith.constant 0 : index
    %20 = vector.load %arg7[%c0_18, %c0_19] : memref<1x64xf32, #tpu.memory_space<vmem>>, vector<1x64xf32>
    %21 = vector.broadcast %20 : vector<1x64xf32> to vector<32x64xf32>
    %22 = arith.addf %19, %21 : vector<32x64xf32>
    %cst_20 = arith.constant 0.000000e+00 : f32
    %23 = vector.broadcast %cst_20 : f32 to vector<32x64xf32>
    %24 = arith.maximumf %22, %23 : vector<32x64xf32>
    %c0_21 = arith.constant 0 : index
    %c0_22 = arith.constant 0 : index
    %25 = vector.load %arg8[%c0_21, %c0_22] : memref<64x16xf32, #tpu.memory_space<vmem>>, vector<64x16xf32>
    %26 = vector.extract_strided_slice %24 {offsets = [0, 0], sizes = [16, 64], strides = [1, 1]} : vector<32x64xf32> to vector<16x64xf32>
    %cst_23 = arith.constant dense<0.000000e+00> : vector<64x64xf32>
    %27 = tpu.matmul %25, %26, %cst_23 {dimension_numbers = #tpu.dot_dimension_numbers<[1], [0], [0], [1], [0, 0, 1, 1], [], []>} : vector<64x16xf32>, vector<16x64xf32>, vector<64x64xf32> -> vector<64x64xf32>
    %28 = vector.extract_strided_slice %24 {offsets = [16, 0], sizes = [16, 64], strides = [1, 1]} : vector<32x64xf32> to vector<16x64xf32>
    %cst_24 = arith.constant dense<0.000000e+00> : vector<64x64xf32>
    %29 = tpu.matmul %25, %28, %cst_24 {dimension_numbers = #tpu.dot_dimension_numbers<[1], [0], [0], [1], [0, 0, 1, 1], [], []>} : vector<64x16xf32>, vector<16x64xf32>, vector<64x64xf32> -> vector<64x64xf32>
    %30 = tpu.concatenate %27, %29 in 1 : vector<64x64xf32>, vector<64x64xf32> -> vector<64x128xf32>
    %c0_25 = arith.constant 0 : index
    %c0_26 = arith.constant 0 : index
    %31 = vector.load %arg9[%c0_25, %c0_26] : memref<64x128xf32, #tpu.memory_space<vmem>>, vector<64x128xf32>
    tpu.vector_store %arg9[%c0_25, %c0_26], %30 {strides = array<i32>} : memref<64x128xf32, #tpu.memory_space<vmem>>, vector<64x128xf32>,
    return
  }
}

</mosaic_0001>

<bundles_post_ra>
// kernel: characteristic_line_extractor.1
= control target key start
LH: loop header
LB: loop body
LE: loop exit
PB: predicated region body
PF: predicated region fallthrough
CT: control target
= control target key end

     0   :  { %14 = vsyncpa [#allocation3], 0  ;;  %s1343_s0 = inlined_call_operand.vmem [shape: f32[32,3], index: 0, kind: input, shape index: {}]   ;;  %s1344_s1 = inlined_call_operand.hbm [shape: f32[3,32], index: 1, kind: input, shape index: {}]   ;;  %s1345_s2 = inlined_call_operand.hbm [shape: f32[1,32], index: 2, kind: input, shape index: {}]   ;;  %s1346_s3 = inlined_call_operand.vmem [shape: f32[32,64], index: 3, kind: input, shape index: {}]   ;;  %s1347_s4 = inlined_call_operand.hbm [shape: f32[1,64], index: 4, kind: input, shape index: {}]   ;;  %s1348_s5 = inlined_call_operand.vmem [shape: f32[32,64], index: 5, kind: input, shape index: {}]   ;;  %s1349_s6 = inlined_call_operand.vmem [shape: f32[64,64], index: 6, kind: input, shape index: {}]   ;;  %s1350_s7 = inlined_call_operand.vmem [shape: f32[1,64], index: 7, kind: input, shape index: {}]   ;;  %s1351_s8 = inlined_call_operand.vmem [shape: f32[64,16], index: 8, kind: input, shape index: {}]   ;;  %s1352_s9 = inlined_call_operand.vmem [shape: f32[64,128], index: 9, kind: output, shape index: {}]  }
   0x1   :  { %15 = vsyncpa [#allocation5], 0  ;;  %s1102_s30 = smov [#allocation4]   ;;  %s1103_s11 = smov [#allocation2]  }
   0x2   :  { %s34_s10 = sshll.u32 %s1102_s30, 4  ;;  %s24_s12 = sshll.u32 %s1103_s11, 4  ;;  %s35_s10 = int_to_ptr.vmem [resolvable:$true] %s34_s10  ;;  %s25_s12 = int_to_ptr.vmem [resolvable:$true] %s24_s12 }
   0x3   :  { %s1032_s15 = scalar_lea.hbm %s1345_s2, 16 }
   0x4   :  { %p1033_p0 = scmp.ne.s32.totalorder %s1345_s2, %s1032_s15  ;;  %p1036_p1 = scmp.lt.u32.totalorder %s1032_s15, %s1345_s2 }
   0x6   :  { %p1038_p2 = pnand %p1036_p1, %p1033_p0 }
   0x8   :  { %1041 = shalt.err (!%p1038_p2)
}
   0x9   :  { %s1042_s20 = scalar_lea.vmem %s35_s10, 16  ;;  %s1046_s21 = scalar_lea.vmem %s35_s10, 32 }
   0xa   :  { %p1043_p3 = scmp.ne.s32.totalorder %s35_s10, %s1042_s20  ;;  %p1047_p4 = scmp.lt.s32.totalorder %s35_s10, %s35_s10 }
   0xb   :  { %p1048_p5 = scmp.lt.s32.totalorder %s1046_s21, %s1042_s20 }
   0xd   :  { %p1049_p6 = por %p1048_p5, %p1047_p4 }
   0xf   :  { %p1050_p7 = pnand %p1049_p6, %p1043_p3 }
  0x11   :  { %1053 = shalt.err (!%p1050_p7)
}
  0x12   :  { %37 = dma.hbm_to_vmem [thread:$0]  %s1345_s2, 16, %s35_s10, [#allocation5]  }
  0x13   :  { %s1054_s26 = scalar_lea.hbm %s1344_s1, 64 }
  0x14   :  { %p1055_p8 = scmp.ne.s32.totalorder %s1344_s1, %s1054_s26  ;;  %p1058_p9 = scmp.lt.u32.totalorder %s1054_s26, %s1344_s1 }
  0x16   :  { %p1060_p10 = pnand %p1058_p9, %p1055_p8 }
  0x18   :  { %1063 = shalt.err (!%p1060_p10)
}
  0x19   :  { %s1064_s11 = scalar_lea.vmem %s25_s12, 64  ;;  %p1069_p12 = scmp.lt.s32.totalorder %s25_s12, %s25_s12 }
  0x1a   :  { %p1065_p11 = scmp.ne.s32.totalorder %s25_s12, %s1064_s11  ;;  %p1070_p13 = scmp.lt.s32.totalorder %s1064_s11, %s1064_s11 }
  0x1c   :  { %p1071_p0 = por %p1070_p13, %p1069_p12 }
  0x1e   :  { %p1072_p1 = pnand %p1071_p0, %p1065_p11 }
  0x20   :  { %1075 = shalt.err (!%p1072_p1)
}
  0x21   :  { %27 = dma.hbm_to_vmem [thread:$0]  %s1344_s1, 64, %s25_s12, [#allocation3]  }
  0x22   :  { %s1104_s13 = smov [#allocation6]   ;;  %s1076_s17 = scalar_lea.hbm %s1347_s4, 16 }
  0x23   :  { %s46_s14 = sshll.u32 %s1104_s13, 4  ;;  %p1077_p2 = scmp.ne.s32.totalorder %s1347_s4, %s1076_s17  ;;  %s47_s14 = int_to_ptr.vmem [resolvable:$true] %s46_s14 }
  0x24   :  { %p1080_p3 = scmp.lt.u32.totalorder %s1076_s17, %s1347_s4 }
  0x26   :  { %p1082_p4 = pnand %p1080_p3, %p1077_p2 }
  0x28   :  { %1085 = shalt.err (!%p1082_p4)
}
  0x29   :  { %s1086_s22 = scalar_lea.vmem %s47_s14, 16  ;;  %s1090_s1 = scalar_lea.vmem %s47_s14, 32 }
  0x2a   :  { %p1087_p5 = scmp.ne.s32.totalorder %s47_s14, %s1086_s22  ;;  %p1091_p6 = scmp.lt.s32.totalorder %s47_s14, %s47_s14 }
  0x2b   :  { %p1092_p7 = scmp.lt.s32.totalorder %s1090_s1, %s1086_s22 }
  0x2d   :  { %p1093_p8 = por %p1092_p7, %p1091_p6 }
  0x2f   :  { %p1094_p9 = pnand %p1093_p8, %p1087_p5 }
  0x31   :  { %1097 = shalt.err (!%p1094_p9)
}
  0x32   :  { %49 = dma.hbm_to_vmem [thread:$0]  %s1347_s4, 16, %s47_s14, [#allocation5]  }
  0x33   :  { %1098 = dma.done.wait [#allocation3], 64  }
  0x34   :  { %1099 = vsyncadd [#allocation3], 4294967232 }
  0x35   :  { %1100 = dma.done.wait [#allocation5], 32  }
  0x36   :  { %1101 = vsyncadd [#allocation5], 4294967264  ;;  %vm92_vm0 = vcmask 1042432   ;;  %vm79_vm1 = vcmask 23552   ;;  %v71_v0 = vld [vmem:[#allocation2] sm:$0x7] }
  0x37   :  { %v67_v1 = vld [vmem:[%s1343_s0] sm:$0xff]  ;;  %v68_v2 = vld [vmem:[%s1343_s0 + $0x8] sm:$0xff]  ;;  %894 = vmatprep.subr.msk.mxu0 %vm92_vm0, %v71_v0  ;;  %v69_v3 = vld [vmem:[%s1343_s0 + $0x10] sm:$0xff]  ;;  %vm196_vm2 = vcmask 261120   ;;  %vm310_vm3 = vcmask 523264   ;;  %vm516_vm4 = vcmask 130048  }
  0x38   :  { %896 = vmatprep.mubr.msk.f32.mxu0 %vm79_vm1, %v67_v1  ;;  %v185_v4 = vld [vmem:[%s1346_s3] sm:$0xff]  ;;  %895 = vmatpush3.msk.msra.mxu0 %vm92_vm0, %v71_v0  ;;  %v186_v5 = vld [vmem:[%s1346_s3 + $0x8] sm:$0xff]  ;;  %v70_v7 = vld [vmem:[%s1343_s0 + $0x18] sm:$0xff] }
  0x39   :  { %897 = vmatmul.mubr.msk.f32.vlgmr.msra.gmra.mrb[0].mxu0 %vm79_vm1, %v68_v2  ;;  %v984_v6 = vpack.c.bf16 %v186_v5, %v185_v4  ;;  %v187_v8 = vld [vmem:[%s1346_s3 + $0x10] sm:$0xff]  ;;  %v188_v9 = vld [vmem:[%s1346_s3 + $0x18] sm:$0xff]  ;;  %v302_v11 = vld [vmem:[%s1349_s6] sm:$0xff] }
  0x3a   :  { %899 = vmatprep.mubr.msk.f32.mxu0 %vm79_vm1, %v69_v3  ;;  %v988_v10 = vpack.c.bf16 %v188_v9, %v187_v8  ;;  %v303_v12 = vld [vmem:[%s1349_s6 + $0x8] sm:$0xff]  ;;  %v805_v14 = vld [vmem:[#allocation4] ss:$0 sm:$0xff]  ;;  %v304_v19 = vld [vmem:[%s1349_s6 + $0x10] sm:$0xff] }
  0x3b   :  { %985 = vmatprep.subr.bf16.mxu0 %v984_v6  ;;  %v992_v13 = vpack.c.bf16 %v303_v12, %v302_v11  ;;  %v305_v20 = vld [vmem:[%s1349_s6 + $0x18] sm:$0xff]  ;;  %v306_v28 = vld [vmem:[%s1349_s6 + $0x20] sm:$0xff]  ;;  %v307_v29 = vld [vmem:[%s1349_s6 + $0x28] sm:$0xff] }
  0x3c   :  { %987 = vmatpush3.bf16.msra.mxu0 %v984_v6  ;;  %v996_v26 = vpack.c.bf16 %v305_v20, %v304_v19  ;;  %v1000_v32 = vpack.c.bf16 %v307_v29, %v306_v28  ;;  %v308_v33 = vld [vmem:[%s1349_s6 + $0x30] sm:$0xff]  ;;  %v309_v34 = vld [vmem:[%s1349_s6 + $0x38] sm:$0xff]  ;;  %v298_v36 = vld [vmem:[%s1348_s5] sm:$0xff] }
  0x3d   :  { %900 = vmatmul.mubr.msk.f32.gmra.mrb[2].mxu0 %vm79_vm1, %v70_v7  ;;  %989 = vmatprep.subr.bf16.mxu0 %v988_v10  ;;  %v1004_v35 = vpack.c.bf16 %v309_v34, %v308_v33  ;;  %v299_v37 = vld [vmem:[%s1348_s5 + $0x8] sm:$0xff]  ;;  %v811_v39 = vld [vmem:[#allocation6] ss:$0 sm:$0xff]  ;;  %v300_v44 = vld [vmem:[%s1348_s5 + $0x10] sm:$0xff] }
  0x3e   :  { %v1008_v38 = vpack.c.bf16 %v299_v37, %v298_v36  ;;  %v301_v45 = vld [vmem:[%s1348_s5 + $0x18] sm:$0xff]  ;;  %v508_v55 = vld [vmem:[%s1351_s8] sm:$0xff]  ;;  %v509_v6 = vld [vmem:[%s1351_s8 + $0x8] sm:$0xff] }
  0x3f   :  { %v1012_v51 = vpack.c.bf16 %v301_v45, %v300_v44  ;;  %956 = vmatprep.mubr.msk.f32.mxu1 %vm516_vm4, %v508_v55  ;;  %v824_v56 = vld [vmem:[%s1350_s7] ss:$0 sm:$0xff]  ;;  %v510_v8 = vld [vmem:[%s1351_s8 + $0x10] sm:$0xff]  ;;  %v511_v9 = vld [vmem:[%s1351_s8 + $0x18] sm:$0xff] }
  0x40   :  { %991 = vmatpush3.bf16.msra.mxu0 %v988_v10  ;;  %v512_v10 = vld [vmem:[%s1351_s8 + $0x20] sm:$0xff]  ;;  %v513_v11 = vld [vmem:[%s1351_s8 + $0x28] sm:$0xff]  ;;  %v514_v12 = vld [vmem:[%s1351_s8 + $0x30] sm:$0xff] }
  0x41   :  { %993 = vmatprep.subr.bf16.mxu0 %v992_v13 }
 0x10c   :  { %v898_v15 = vpop.f32.mrb[0].mxu0 }
 0x10d   :  { %v168_v16 = vadd.f32 %v898_v15, %v805_v14  ;;  %v162_v17 = vpop.f32.mrb[1].mxu0 }
 0x10e   :  { %v163_v18 = vadd.f32 %v805_v14, %v162_v17 }
 0x10f   :  { %v182_v23 = vmax.f32 %v168_v16, 0.0 }
 0x110   :  { %v181_v21 = vmax.f32 %v163_v18, 0.0  ;;  %v901_v22 = vpop.f32.mrb[2].mxu0 }
 0x111   :  { %v178_v24 = vadd.f32 %v901_v22, %v805_v14  ;;  %v172_v25 = vpop.f32.mrb[3].mxu0 }
 0x112   :  { %v173_v27 = vadd.f32 %v805_v14, %v172_v25  ;;  %910 = vmatprep.mubr.msk.f32.mxu0 %vm196_vm2, %v181_v21 }
 0x113   :  { %911 = vmatmul.mubr.msk.f32.vlgmr.msra.gmra.mrb[4].mxu0 %vm196_vm2, %v182_v23  ;;  %v184_v31 = vmax.f32 %v178_v24, 0.0 }
 0x114   :  { %v183_v30 = vmax.f32 %v173_v27, 0.0  ;;  %995 = vmatpush3.bf16.msra.mxu0 %v992_v13  ;;  %v515_v13 = vld [vmem:[%s1351_s8 + $0x38] sm:$0xff]  ;;  %s1105_s8 = smov 64  }
 0x115   :  { %997 = vmatprep.subr.bf16.mxu0 %v996_v26 }
 0x116   :  { %913 = vmatprep.mubr.msk.f32.mxu0 %vm196_vm2, %v183_v30 }
 0x117   :  { %914 = vmatmul.mubr.msk.f32.gmra.mrb[6].mxu0 %vm196_vm2, %v184_v31 }
 0x118   :  { %999 = vmatpush3.bf16.msra.mxu0 %v996_v26 }
 0x119   :  { %1001 = vmatprep.subr.bf16.mxu0 %v1000_v32 }
 0x11c   :  { %1003 = vmatpush3.bf16.msra.mxu0 %v1000_v32 }
 0x11d   :  { %1005 = vmatprep.subr.bf16.mxu0 %v1004_v35 }
 0x120   :  { %1007 = vmatpush3.bf16.msra.mxu0 %v1004_v35 }
 0x121   :  { %1009 = vmatprep.subr.bf16.mxu0 %v1008_v38 }
 0x1e6   :  { %v912_v40 = vpop.f32.mrb[4].mxu0 }
 0x1e7   :  { %v281_v41 = vadd.f32 %v912_v40, %v811_v39  ;;  %v275_v42 = vpop.f32.mrb[5].mxu0 }
 0x1e8   :  { %v276_v43 = vadd.f32 %v811_v39, %v275_v42 }
 0x1e9   :  { %v295_v48 = vmax.f32 %v281_v41, 0.0 }
 0x1ea   :  { %v294_v46 = vmax.f32 %v276_v43, 0.0  ;;  %v915_v47 = vpop.f32.mrb[6].mxu0 }
 0x1eb   :  { %v291_v49 = vadd.f32 %v915_v47, %v811_v39  ;;  %v285_v50 = vpop.f32.mrb[7].mxu0 }
 0x1ec   :  { %v286_v52 = vadd.f32 %v811_v39, %v285_v50  ;;  %932 = vmatprep.mubr.msk.f32.mxu0 %vm310_vm3, %v294_v46 }
 0x1ed   :  { %933 = vmatmul.mubr.msk.f32.vlgmr.msra.gmra.mrb[8].mxu0 %vm310_vm3, %v295_v48  ;;  %v297_v54 = vmax.f32 %v291_v49, 0.0 }
 0x1ee   :  { %v296_v53 = vmax.f32 %v286_v52, 0.0  ;;  %1011 = vmatpush3.bf16.msra.mxu0 %v1008_v38 }
 0x1ef   :  { %1013 = vmatprep.subr.bf16.mxu0 %v1012_v51 }
 0x1f0   :  { %935 = vmatprep.mubr.msk.f32.mxu0 %vm310_vm3, %v296_v53 }
 0x1f1   :  { %936 = vmatmul.mubr.msk.f32.gmra.mrb[10].mxu0 %vm310_vm3, %v297_v54 }
 0x1f2   :  { %1015 = vmatpush3.bf16.msra.mxu0 %v1012_v51  ;;  %946 = vmatprep.mubr.msk.f32.mxu0 %vm196_vm2, %v181_v21 }
 0x1f5   :  { %947 = vmatmul.mubr.msk.f32.vlgmr.msra.gmra.mrb[8].mxu0 %vm196_vm2, %v182_v23 }
 0x1f6   :  { %949 = vmatprep.mubr.msk.f32.mxu0 %vm196_vm2, %v183_v30 }
 0x1f9   :  { %950 = vmatmul.mubr.msk.f32.gmra.mrb[10].mxu0 %vm196_vm2, %v184_v31 }
 0x2c8   :  { %v948_v57 = vpop.f32.mrb[8].mxu0 }
 0x2c9   :  { %v501_v58 = vadd.f32 %v948_v57, %v824_v56  ;;  %v474_v59 = vpop.f32.mrb[9].mxu0 }
 0x2ca   :  { %v500_v60 = vadd.f32 %v824_v56, %v474_v59 }
 0x2cb   :  { %v505_v61 = vmax.f32 %v501_v58, 0.0 }
 0x2cc   :  { %v504_v62 = vmax.f32 %v500_v60, 0.0  ;;  %v951_v63 = vpop.f32.mrb[10].mxu0 }
 0x2cd   :  { %v503_v0 = vadd.f32 %v951_v63, %v824_v56  ;;  %v484_v1 = vpop.f32.mrb[11].mxu0 }
 0x2ce   :  { %v502_v2 = vadd.f32 %v824_v56, %v484_v1  ;;  %v1016_v3 = vpack.c.bf16 %v505_v61, %v504_v62 }
 0x2cf   :  { %v507_v4 = vmax.f32 %v503_v0, 0.0 }
 0x2d0   :  { %v506_v5 = vmax.f32 %v502_v2, 0.0  ;;  %1017 = vmatprep.subr.bf16.mxu1 %v1016_v3 }
 0x2d1   :  { %1019 = vmatpush3.bf16.msra.mxu1 %v1016_v3 }
 0x2d2   :  { %v1020_v7 = vpack.c.bf16 %v507_v4, %v506_v5 }
 0x2d4   :  { %957 = vmatmul.mubr.msk.f32.vlgmr.msra.gmra.mrb[0].mxu1 %vm516_vm4, %v509_v6  ;;  %1021 = vmatprep.subr.bf16.mxu1 %v1020_v7 }
 0x2d5   :  { %1023 = vmatpush3.bf16.msra.mxu1 %v1020_v7  ;;  %959 = vmatprep.mubr.msk.f32.mxu1 %vm516_vm4, %v510_v8 }
 0x2d8   :  { %960 = vmatmul.mubr.msk.f32.gmra.mrb[2].mxu1 %vm516_vm4, %v511_v9 }
 0x2d9   :  { %962 = vmatprep.mubr.msk.f32.mxu1 %vm516_vm4, %v512_v10 }
 0x2dc   :  { %963 = vmatmul.mubr.msk.f32.gmra.mrb[4].mxu1 %vm516_vm4, %v513_v11 }
 0x2dd   :  { %965 = vmatprep.mubr.msk.f32.mxu1 %vm516_vm4, %v514_v12 }
 0x2e0   :  { %966 = vmatmul.mubr.msk.f32.gmra.mrb[6].mxu1 %vm516_vm4, %v515_v13 }
 0x2e1   :  { %972 = vmatprep.mubr.msk.f32.mxu1 %vm516_vm4, %v508_v55 }
 0x2e4   :  { %973 = vmatmul.mubr.msk.f32.vlgmr.msra.gmra.mrb[8].mxu1 %vm516_vm4, %v509_v6 }
 0x2e5   :  { %975 = vmatprep.mubr.msk.f32.mxu1 %vm516_vm4, %v510_v8 }
 0x2e8   :  { %976 = vmatmul.mubr.msk.f32.gmra.mrb[10].mxu1 %vm516_vm4, %v511_v9 }
 0x2e9   :  { %978 = vmatprep.mubr.msk.f32.mxu1 %vm516_vm4, %v512_v10 }
 0x2ec   :  { %979 = vmatmul.mubr.msk.f32.gmra.mrb[12].mxu1 %vm516_vm4, %v513_v11 }
 0x2ed   :  { %981 = vmatprep.mubr.msk.f32.mxu1 %vm516_vm4, %v514_v12 }
 0x2f0   :  { %982 = vmatmul.mubr.msk.f32.gmra.mrb[14].mxu1 %vm516_vm4, %v515_v13 }
 0x3a7   :  { %v958_v14 = vpop.f32.mrb[0].mxu1 }
 0x3a8   :  { %v607_v15 = vpop.f32.mrb[1].mxu1 }
 0x3ab   :  { %v961_v16 = vpop.f32.mrb[2].mxu1 }
 0x3ac   :  { %v617_v17 = vpop.f32.mrb[3].mxu1 }
 0x3af   :  { %v964_v18 = vpop.f32.mrb[4].mxu1 }
 0x3b0   :  { %v627_v19 = vpop.f32.mrb[5].mxu1 }
 0x3b3   :  { %v967_v20 = vpop.f32.mrb[6].mxu1 }
 0x3b4   :  { %v637_v21 = vpop.f32.mrb[7].mxu1 }
 0x3b7   :  { %v974_v22 = vpop.f32.mrb[8].mxu1 }
 0x3b8   :  { %761 = vrot.lane.b32.xlu0 %v974_v22, %s1105_s8  ;;  %v712_v23 = vpop.f32.mrb[9].mxu1 }
 0x3bb   :  { %v977_v24 = vpop.f32.mrb[10].mxu1 }
 0x3bc   :  { %759 = vrot.lane.b32.xlu0 %v712_v23, %s1105_s8  ;;  %765 = vrot.lane.b32.xlu1 %v977_v24, %s1105_s8  ;;  %v722_v25 = vpop.f32.mrb[11].mxu1 }
 0x3bf   :  { %v980_v26 = vpop.f32.mrb[12].mxu1 }
 0x3c0   :  { %763 = vrot.lane.b32.xlu1 %v722_v25, %s1105_s8  ;;  %v732_v27 = vpop.f32.mrb[13].mxu1 }
 0x3c1   :  { %767 = vrot.lane.b32.xlu0 %v732_v27, %s1105_s8 }
 0x3c3   :  { %v983_v28 = vpop.f32.mrb[14].mxu1 }
 0x3c4   :  { %769 = vrot.lane.b32.xlu1 %v980_v26, %s1105_s8  ;;  %v742_v29 = vpop.f32.mrb[15].mxu1 }
 0x3c5   :  { %771 = vrot.lane.b32.xlu0 %v742_v29, %s1105_s8 }
 0x3c8   :  { %773 = vrot.lane.b32.xlu1 %v983_v28, %s1105_s8 }
 0x42a   :  { %v762_v30 = vpop.permute.xlu0 %761 }
 0x42b   :  { %v784_v31 = vsel %vm310_vm3, %v958_v14, %v762_v30 }
 0x42c   :  { %792 = vst [vmem:[%s1352_s9 + $0x8] sm:$0xff] %v784_v31 }
 0x42e   :  { %v760_v32 = vpop.permute.xlu0 %759  ;;  %v766_v33 = vpop.permute.xlu1 %765 }
 0x42f   :  { %v783_v34 = vsel %vm310_vm3, %v607_v15, %v760_v32  ;;  %v786_v35 = vsel %vm310_vm3, %v961_v16, %v766_v33 }
 0x430   :  { %791 = vst [vmem:[%s1352_s9] sm:$0xff] %v783_v34  ;;  %794 = vst [vmem:[%s1352_s9 + $0x18] sm:$0xff] %v786_v35 }
 0x432   :  { %v764_v36 = vpop.permute.xlu1 %763 }
 0x433   :  { %v785_v37 = vsel %vm310_vm3, %v617_v17, %v764_v36  ;;  %v768_v38 = vpop.permute.xlu0 %767 }
 0x434   :  { %793 = vst [vmem:[%s1352_s9 + $0x10] sm:$0xff] %v785_v37  ;;  %v787_v39 = vsel %vm310_vm3, %v627_v19, %v768_v38 }
 0x435   :  { %795 = vst [vmem:[%s1352_s9 + $0x20] sm:$0xff] %v787_v39 }
 0x436   :  { %v770_v40 = vpop.permute.xlu1 %769 }
 0x437   :  { %v788_v41 = vsel %vm310_vm3, %v964_v18, %v770_v40  ;;  %v772_v42 = vpop.permute.xlu0 %771 }
 0x438   :  { %796 = vst [vmem:[%s1352_s9 + $0x28] sm:$0xff] %v788_v41  ;;  %v789_v43 = vsel %vm310_vm3, %v637_v21, %v772_v42 }
 0x439   :  { %797 = vst [vmem:[%s1352_s9 + $0x30] sm:$0xff] %v789_v43 }
 0x43a   :  { %v774_v44 = vpop.permute.xlu1 %773 }
 0x43b   :  { %v790_v45 = vsel %vm310_vm3, %v967_v20, %v774_v44 }
 0x43c   :  { %798 = vst [vmem:[%s1352_s9 + $0x38] sm:$0xff] %v790_v45 }
 0x43d   :  { %803 = vsyncpa [#allocation3], 1 }
 0x43e   :  { %804 = vsyncpa [#allocation5], 1 }

</bundles_post_ra>
